<compile_context>
chip_gen: v7x
topology: tpu7x:2x2x1
jax: 0.10.0
libtpu: 0.0.40
codegen_flags: <defaults>
</compile_context>

<pallas_src>
import functools
import math

import jax
import jax.numpy as jnp
from jax.experimental import pallas as pl
from jax.experimental.pallas import tpu as pltpu


def _round_up(v, m):
    return (v + m - 1) // m * m


# ---------------------------------------------------------------------------
# Kernels
# ---------------------------------------------------------------------------
def _logits_kernel(x_ref, w_ref, invn_ref, logits_ref):
    """Inference path: cosine logits tile = (x @ W_tile^T) * inv_norm_tile."""
    raw = jax.lax.dot_general(
        x_ref[...], w_ref[...],
        dimension_numbers=(((1,), (1,)), ((), ())),
        preferred_element_type=jnp.float32)
    logits_ref[...] = raw * invn_ref[...]          # (tm, tn) * (1, tn)


def _train_kernel(s_ref, x_ref, w_ref, invn_ref, logits_ref, bsum_ref,
                  *, n_rows, n_cols, need_mask):
    """Training path: logits tile + masked partial sum of exp(s * logits).

    n_rows / n_cols are the *valid* (un-padded) batch / class counts (static);
    padded rows/columns are excluded from the exp-sum so padding never leaks
    into B_avg.
    """
    raw = jax.lax.dot_general(
        x_ref[...], w_ref[...],
        dimension_numbers=(((1,), (1,)), ((), ())),
        preferred_element_type=jnp.float32)
    logits = raw * invn_ref[...]                   # (tm, tn) f32
    logits_ref[...] = logits

    s = s_ref[0]                                   # scalar from SMEM
    e = jnp.exp(s * logits)
    if need_mask:
        tm, tn = logits.shape
        row = (jax.lax.broadcasted_iota(jnp.int32, (tm, tn), 0)
               + pl.program_id(0) * tm)
        col = (jax.lax.broadcasted_iota(jnp.int32, (tm, tn), 1)
               + pl.program_id(1) * tn)
        valid = (row < n_rows) & (col < n_cols)
        e = jnp.where(valid, e, 0.0)
    # Per-grid-cell partial sum, broadcast over a full (8,128) block so the
    # store stays lane-dense / tile-aligned on every TPU generation.
    bsum_ref[...] = jnp.zeros((8, 128), jnp.float32) + jnp.sum(e)


# ---------------------------------------------------------------------------
# Wrapper
# ---------------------------------------------------------------------------
def adacos_forward(x, W, s, label=None, *, tm=128, tn=512, use_bf16=False):
    """AdaCos forward.  Returns logits if label is None, else (output, new_s)."""
    x = jnp.asarray(x, jnp.float32)
    W = jnp.asarray(W, jnp.float32)
    N, F_ = x.shape
    C = W.shape[0]

    # Tile sizes: sublane-multiple rows, lane-multiple (128) classes.
    tm = _round_up(min(tm, _round_up(N, 8)), 8)
    tn = _round_up(min(tn, _round_up(C, 128)), 128)
    Np, Cp = _round_up(N, tm), _round_up(C, tn)
    gi, gj = Np // tm, Cp // tn
    need_mask = (Np != N) or (Cp != C)

    # Per-class inverse L2 norm, hoisted out of the kernel (F.normalize eps).
    inv_norm = 1.0 / jnp.maximum(jnp.sqrt(jnp.sum(W * W, axis=1)), 1e-12)

    mat_dtype = jnp.bfloat16 if use_bf16 else jnp.float32
    x_p = jnp.pad(x, ((0, Np - N), (0, 0))).astype(mat_dtype)
    W_p = jnp.pad(W, ((0, Cp - C), (0, 0))).astype(mat_dtype)
    invn_p = jnp.pad(inv_norm, ((0, Cp - C),)).reshape(1, Cp)

    # VMEM budget: double-buffered tiles, clamped so it is safe on v7x (64 MiB
    # physical) while never shrinking below the conservative default.
    isz = jnp.dtype(mat_dtype).itemsize
    vmem_est = 2 * (isz * (tm + tn) * F_ + 4 * (tm * tn + tn + 8 * 128))
    vmem_limit = min(max(2 * vmem_est + (4 << 20), 32 << 20), 48 << 20)
    cparams = pltpu.CompilerParams(
        dimension_semantics=("parallel", "parallel"),
        vmem_limit_bytes=vmem_limit)

    x_spec = pl.BlockSpec((tm, F_), lambda i, j, *_: (i, 0))
    w_spec = pl.BlockSpec((tn, F_), lambda i, j, *_: (j, 0))
    inv_spec = pl.BlockSpec((1, tn), lambda i, j, *_: (0, j))
    logit_spec = pl.BlockSpec((tm, tn), lambda i, j, *_: (i, j))

    if label is None:
        # Inference specialization: pure MXU/DMA work, no exp / mask / label.
        logits_p = pl.pallas_call(
            _logits_kernel,
            out_shape=jax.ShapeDtypeStruct((Np, Cp), jnp.float32),
            grid_spec=pltpu.PrefetchScalarGridSpec(
                num_scalar_prefetch=0,
                grid=(gi, gj),
                in_specs=[x_spec, w_spec, inv_spec],
                out_specs=logit_spec),
            compiler_params=cparams,
        )(x_p, W_p, invn_p)
        return logits_p[:N, :C]

    label = jnp.asarray(label).reshape(N).astype(jnp.int32)
    s_arr = jnp.asarray(s, dtype=jnp.float32).reshape(1)

    kernel = functools.partial(_train_kernel, n_rows=N, n_cols=C,
                               need_mask=need_mask)
    bsum_spec = pl.BlockSpec((8, 128), lambda i, j, *_: (i, j))

    logits_p, bsum_p = pl.pallas_call(
        kernel,
        out_shape=(jax.ShapeDtypeStruct((Np, Cp), jnp.float32),
                   jax.ShapeDtypeStruct((gi * 8, gj * 128), jnp.float32)),
        grid_spec=pltpu.PrefetchScalarGridSpec(
            num_scalar_prefetch=0,
            grid=(gi, gj),
            in_specs=[
                pl.BlockSpec(memory_space=pltpu.MemorySpace.SMEM),  # s (1,)
                x_spec, w_spec, inv_spec,
            ],
            out_specs=(logit_spec, bsum_spec)),
        compiler_params=cparams,
    )(s_arr, x_p, W_p, invn_p)

    logits = logits_p[:N, :C]

    # ---- O(N) glue (matches the torch.no_grad() block semantics) ----
    s0 = s_arr[0]
    lab_logit = jnp.take_along_axis(logits, label[:, None], axis=1)[:, 0]
    bsum_total = jnp.sum(bsum_p[0::8, 0::128])          # one partial per tile
    B_avg = (bsum_total - jnp.sum(jnp.exp(s0 * lab_logit))) / N
    theta_lab = jnp.arccos(jnp.clip(lab_logit, -1.0 + 1e-7, 1.0 - 1e-7))
    # torch.median on an even-length vector returns the LOWER middle value.
    theta_med = jnp.sort(theta_lab)[(N - 1) // 2]
    s_new = jnp.log(B_avg) / jnp.cos(
        jnp.minimum(jnp.float32(math.pi / 4), theta_med))
    return s_new * logits, s_new


# ---------------------------------------------------------------------------
# Pure-JAX reference (reproduces the PyTorch forward) for verification
# ---------------------------------------------------------------------------
def _reference(x, W, s, label):
    Wn = W / jnp.maximum(
        jnp.sqrt(jnp.sum(W * W, axis=1, keepdims=True)), 1e-12)
    logits = jax.lax.dot_general(
        x, Wn, dimension_numbers=(((1,), (1,)), ((), ())),
        precision=jax.lax.Precision.HIGHEST)
    theta = jnp.arccos(jnp.clip(logits, -1.0 + 1e-7, 1.0 - 1e-7))
    one_hot = jax.nn.one_hot(label, W.shape[0], dtype=jnp.float32)
    B_avg = jnp.sum(jnp.where(one_hot < 1.0, jnp.exp(s * logits), 0.0)) / x.shape[0]
    theta_lab = jnp.sum(theta * one_hot, axis=1)
    theta_med = jnp.sort(theta_lab)[(x.shape[0] - 1) // 2]
    s_new = jnp.log(B_avg) / jnp.cos(
        jnp.minimum(jnp.float32(math.pi / 4), theta_med))
    return s_new * logits, s_new, logits


if __name__ == "__main__":
    base_key = jax.random.PRNGKey(0)

    def run_case(case_id, N, F_, C, tm, tn):
        k1, k2, k3 = jax.random.split(jax.random.fold_in(base_key, case_id), 3)
        x = jax.random.normal(k1, (N, F_), dtype=jnp.float32)
        bound = math.sqrt(6.0 / (F_ + C))                 # xavier_uniform_
        W = jax.random.uniform(k2, (C, F_), dtype=jnp.float32,
                               minval=-bound, maxval=bound)
        label = jax.random.randint(k3, (N,), 0, C)
        s0 = math.sqrt(2.0) * math.log(C - 1)             # AdaCos initial scale

        # inference path (label=None): plain cosine logits
        logits = adacos_forward(x, W, s0, None, tm=tm, tn=tn)
        # training path: rescaled logits + updated scale (module state)
        out, s_new = adacos_forward(x, W, s0, label, tm=tm, tn=tn)
        jax.block_until_ready((logits, out, s_new))

        ref_out, ref_s, ref_logits = _reference(x, W, jnp.float32(s0), label)
        assert jnp.allclose(logits, ref_logits, atol=1e-4, rtol=1e-5), case_id
        assert jnp.allclose(out, ref_out, atol=1e-3, rtol=1e-4), case_id
        assert jnp.allclose(s_new, ref_s, atol=1e-4, rtol=1e-5), case_id

        # bf16-MXU fast path (f32 accumulation): run + loose sanity check only,
        # since acos / exp(s*.) amplify bf16 input rounding.
        out_bf, s_bf = adacos_forward(x, W, s0, label, tm=tm, tn=tn,
                                      use_bf16=True)
        jax.block_until_ready((out_bf, s_bf))
        assert jnp.allclose(out_bf, ref_out, atol=0.5, rtol=0.05), case_id

    # small single-tile shape: batch=8, feature=32, classes=16
    run_case(0, N=8, F_=32, C=16, tm=128, tn=512)
    # multi-tile 2-D grid with batch- and class-padding (exercises masking)
    run_case(1, N=24, F_=64, C=200, tm=16, tn=128)

    print("KERNEL_OK")
</pallas_src>

<mosaic_0001>
module attributes {stable_mosaic.version = 11 : i64} {
  func.func @_logits_kernel(%arg0: i32, %arg1: i32, %arg2: memref<8x32xf32, #tpu.memory_space<vmem>>, %arg3: memref<128x32xf32, #tpu.memory_space<vmem>>, %arg4: memref<1x128xf32, #tpu.memory_space<vmem>>, %arg5: memref<8x128xf32, #tpu.memory_space<vmem>>) attributes {dimension_semantics = [#tpu.dimension_semantics<parallel>, #tpu.dimension_semantics<parallel>], iteration_bounds = array<i64: 1, 1>, scalar_prefetch = 0 : i64, scratch_operands = 0 : i64, tpu.core_type = #tpu.core_type<tc>, window_params = [{transform_indices = @transform_0, window_bounds = array<i64: 8, 32>}, {transform_indices = @transform_1, window_bounds = array<i64: 128, 32>}, {transform_indices = @transform_2, window_bounds = array<i64: 1, 128>}, {transform_indices = @transform_3, window_bounds = array<i64: 8, 128>}]} {
    %c0 = arith.constant 0 : index
    %c0_0 = arith.constant 0 : index
    %0 = vector.load %arg2[%c0, %c0_0] : memref<8x32xf32, #tpu.memory_space<vmem>>, vector<8x32xf32>
    %c0_1 = arith.constant 0 : index
    %c0_2 = arith.constant 0 : index
    %1 = vector.load %arg3[%c0_1, %c0_2] : memref<128x32xf32, #tpu.memory_space<vmem>>, vector<128x32xf32>
    %cst = arith.constant dense<0.000000e+00> : vector<8x128xf32>
    %2 = tpu.matmul %0, %1, %cst {dimension_numbers = #tpu.dot_dimension_numbers<[1], [1], [0], [0], [0, 0, 1, 0], [], []>} : vector<8x32xf32>, vector<128x32xf32>, vector<8x128xf32> -> vector<8x128xf32>
    %c0_3 = arith.constant 0 : index
    %c0_4 = arith.constant 0 : index
    %3 = vector.load %arg4[%c0_3, %c0_4] : memref<1x128xf32, #tpu.memory_space<vmem>>, vector<1x128xf32>
    %4 = vector.broadcast %3 : vector<1x128xf32> to vector<8x128xf32>
    %5 = arith.mulf %2, %4 : vector<8x128xf32>
    %c0_5 = arith.constant 0 : index
    %c0_6 = arith.constant 0 : index
    %6 = vector.load %arg5[%c0_5, %c0_6] : memref<8x128xf32, #tpu.memory_space<vmem>>, vector<8x128xf32>
    tpu.vector_store %arg5[%c0_5, %c0_6], %5 {strides = array<i32>} : memref<8x128xf32, #tpu.memory_space<vmem>>, vector<8x128xf32>,
    return
  }
  func.func @transform_0(%arg0: i32, %arg1: i32) -> (i32, i32) {
    %c0_i32 = arith.constant 0 : i32
    %c0_i32_0 = arith.constant 0 : i32
    return %arg0, %c0_i32 : i32, i32
  }
  func.func @transform_1(%arg0: i32, %arg1: i32) -> (i32, i32) {
    %c0_i32 = arith.constant 0 : i32
    %c0_i32_0 = arith.constant 0 : i32
    return %arg1, %c0_i32 : i32, i32
  }
  func.func @transform_2(%arg0: i32, %arg1: i32) -> (i32, i32) {
    %c0_i32 = arith.constant 0 : i32
    %c0_i32_0 = arith.constant 0 : i32
    return %c0_i32, %arg1 : i32, i32
  }
  func.func @transform_3(%arg0: i32, %arg1: i32) -> (i32, i32) {
    %c0_i32 = arith.constant 0 : i32
    return %arg0, %arg1 : i32, i32
  }
}

</mosaic_0001>

<bundles_post_ra>
// kernel: tpu_custom_call.1
= control target key start
LH: loop header
LB: loop body
LE: loop exit
PB: predicated region body
PF: predicated region fallthrough
CT: control target
= control target key end

     0   :  { %vm32_vm0 = vcmask 261120   ;;  %v307_v2 = vmov 0.0|0.0   ;;  %vm308_vm2 = vmmov 0   ;;  %v309_v5 = vmov 0.0   ;;  %s420_s0 = inlined_call_operand.vmem [shape: f32[8,32], index: 0, kind: input, shape index: {}]   ;;  %s421_s1 = inlined_call_operand.vmem [shape: f32[128,32], index: 1, kind: input, shape index: {}]   ;;  %s422_s2 = inlined_call_operand.vmem [shape: f32[1,128], index: 2, kind: input, shape index: {}]   ;;  %s423_s3 = inlined_call_operand.hbm [shape: f32[8,128], index: 3, kind: output, shape index: {}]  }
   0x1   :  { %v16_v0 = vld [vmem:[%s421_s1] sm:$0xff]  ;;  %v17_v1 = vld [vmem:[%s421_s1 + $0x8] sm:$0xff]  ;;  %247 = vmatprep.subr.bf16.mxu0 %v307_v2  ;;  %vm339_vm1 = vmpackc.low %vm32_vm0, %vm32_vm0  ;;  %244 = vmatprep.mubr.msk.f32.mxu0 %vm308_vm2, %v309_v5 }
   0x2   :  { %v248_v3 = vpack.c.bf16 %v17_v1, %v16_v0  ;;  %v18_v6 = vld [vmem:[%s421_s1 + $0x10] sm:$0xff]  ;;  %v19_v7 = vld [vmem:[%s421_s1 + $0x18] sm:$0xff] }
   0x4   :  { %250 = vmatpush3.bf16.xpose.msk.msra.mxu0 %vm339_vm1, %v248_v3 }
   0x5   :  { %251 = vmatprep.subr.bf16.mxu0 %v307_v2 }
   0x6   :  { %8 = vsyncpa [#allocation3], 0  ;;  %v252_v8 = vpack.c.bf16 %v19_v7, %v18_v6  ;;  %v20_v9 = vld [vmem:[%s421_s1 + $0x20] sm:$0xff]  ;;  %v21_v10 = vld [vmem:[%s421_s1 + $0x28] sm:$0xff]  ;;  %s310_s21 = smov [#allocation2]  }
   0x7   :  { %v256_v11 = vpack.c.bf16 %v21_v10, %v20_v9  ;;  %v22_v12 = vld [vmem:[%s421_s1 + $0x30] sm:$0xff]  ;;  %v23_v13 = vld [vmem:[%s421_s1 + $0x38] sm:$0xff]  ;;  %v24_v15 = vld [vmem:[%s421_s1 + $0x40] sm:$0xff]  ;;  %s169_s22 = sshll.u32 %s310_s21, 4  ;;  %s170_s22 = int_to_ptr.vmem [resolvable:$true] %s169_s22 }
   0x8   :  { %v260_v14 = vpack.c.bf16 %v23_v13, %v22_v12  ;;  %v25_v16 = vld [vmem:[%s421_s1 + $0x48] sm:$0xff]  ;;  %v26_v18 = vld [vmem:[%s421_s1 + $0x50] sm:$0xff]  ;;  %v27_v19 = vld [vmem:[%s421_s1 + $0x58] sm:$0xff]  ;;  %p288_p1 = scmp.lt.s32.totalorder %s170_s22, %s170_s22 }
   0x9   :  { %v264_v17 = vpack.c.bf16 %v25_v16, %v24_v15  ;;  %v268_v20 = vpack.c.bf16 %v27_v19, %v26_v18  ;;  %v28_v21 = vld [vmem:[%s421_s1 + $0x60] sm:$0xff]  ;;  %v29_v22 = vld [vmem:[%s421_s1 + $0x68] sm:$0xff]  ;;  %v30_v24 = vld [vmem:[%s421_s1 + $0x70] sm:$0xff] }
   0xa   :  { %v272_v23 = vpack.c.bf16 %v29_v22, %v28_v21  ;;  %v31_v25 = vld [vmem:[%s421_s1 + $0x78] sm:$0xff]  ;;  %v15_v27 = vld [vmem:[%s420_s0] sm:$0xff]  ;;  %s283_s1 = scalar_lea.vmem %s170_s22, 128 }
   0xb   :  { %v276_v26 = vpack.c.bf16 %v31_v25, %v30_v24  ;;  %v194_v28 = vld [vmem:[%s422_s2] ss:$0 sm:$0xff]  ;;  %p284_p0 = scmp.ne.s32.totalorder %s170_s22, %s283_s1  ;;  %p289_p2 = scmp.lt.s32.totalorder %s283_s1, %s283_s1 }
   0xc   :  { %254 = vmatpush3.bf16.xpose.msk.msra.mxu0 %vm339_vm1, %v252_v8 }
   0xd   :  { %255 = vmatprep.subr.bf16.mxu0 %v307_v2  ;;  %p290_p3 = por %p289_p2, %p288_p1 }
   0xf   :  { %p291_p4 = pnand %p290_p3, %p284_p0 }
  0x14   :  { %258 = vmatpush3.bf16.xpose.msk.msra.mxu0 %vm339_vm1, %v256_v11 }
  0x15   :  { %259 = vmatprep.subr.bf16.mxu0 %v307_v2 }
  0x1c   :  { %262 = vmatpush3.bf16.xpose.msk.msra.mxu0 %vm339_vm1, %v260_v14 }
  0x1d   :  { %263 = vmatprep.subr.bf16.mxu0 %v307_v2 }
  0x24   :  { %266 = vmatpush3.bf16.xpose.msk.msra.mxu0 %vm339_vm1, %v264_v17 }
  0x25   :  { %267 = vmatprep.subr.bf16.mxu0 %v307_v2 }
  0x2c   :  { %270 = vmatpush3.bf16.xpose.msk.msra.mxu0 %vm339_vm1, %v268_v20 }
  0x2d   :  { %271 = vmatprep.subr.bf16.mxu0 %v307_v2 }
  0x34   :  { %274 = vmatpush3.bf16.xpose.msk.msra.mxu0 %vm339_vm1, %v272_v23 }
  0x35   :  { %275 = vmatprep.subr.bf16.mxu0 %v307_v2 }
  0x3c   :  { %278 = vmatpush3.bf16.xpose.msk.msra.mxu0 %vm339_vm1, %v276_v26 }
  0x43   :  { %245 = vmatmul.mubr.msk.f32.vlgmr.msra.gmra.mrb[0].mxu0 %vm32_vm0, %v15_v27 }
 0x116   :  { %v150_v29 = vpop.f32.mrb[0].mxu0 }
 0x117   :  { %v161_v30 = vmul.f32 %v194_v28, %v150_v29  ;;  %v246_v31 = vpop.f32.mrb[1].mxu0 }
 0x119   :  { %162 = vst [vmem:[#allocation2] sm:$0xff] %v161_v30 }
 0x11a   :  { %294 = shalt.err (!%p291_p4)
}
 0x11b   :  { %s295_s24 = scalar_lea.hbm %s423_s3, 128 }
 0x11c   :  { %p296_p5 = scmp.ne.s32.totalorder %s423_s3, %s295_s24  ;;  %p299_p6 = scmp.lt.u32.totalorder %s295_s24, %s423_s3 }
 0x11e   :  { %p301_p7 = pnand %p299_p6, %p296_p5 }
 0x120   :  { %304 = shalt.err (!%p301_p7)
}
 0x121   :  { %172 = dma.vmem_to_hbm [thread:$0]  %s170_s22, 128, %s423_s3, [#allocation3]  }
 0x122   :  { %305 = dma.done.wait [#allocation3], 128  }
 0x123   :  { %306 = vsyncadd [#allocation3], 4294967168 }
 0x124   :  { %176 = vsyncpa [#allocation3], 1 }

</bundles_post_ra>
